<compile_context>
chip_gen: v6e
topology: v6e:2x2x1
jax: 0.10.0
libtpu: 0.0.40
codegen_flags: <defaults>
</compile_context>

<pallas_src>
import functools

import jax
import jax.numpy as jnp
from jax import lax
from jax.experimental import pallas as pl
from jax.experimental.pallas import tpu as pltpu


def _pick_tile(dim, candidates):
    """Largest candidate evenly dividing dim; else the full dim (always a legal block)."""
    for c in candidates:
        if dim % c == 0:
            return c
    return dim


# ----------------------------- fused q/k/v projection -----------------------------

def _linear_kernel(x_ref, w_ref, b_ref, o_ref, acc_ref):
    # blocks: x (1,tm,tk) bf16, w (1,tk,tn) bf16, b (1,1,tn) f32, o (1,tm,tn) bf16
    # grid = (proj, m, n, k); reduction axis k is innermost / "arbitrary".
    kk = pl.program_id(3)

    @pl.when(kk == 0)
    def _():
        acc_ref[...] = jnp.zeros_like(acc_ref)

    acc_ref[...] += jnp.dot(x_ref[0], w_ref[0], preferred_element_type=jnp.float32)

    @pl.when(kk == pl.num_programs(3) - 1)
    def _():
        o_ref[0] = (acc_ref[...] + b_ref[0]).astype(o_ref.dtype)


def pallas_fused_qkv_projection(x_stack, w_stack, b_stack, *, tm, tn, tk):
    """x_stack (3,N,D) bf16, w_stack (3,D,D) bf16 (input-major), b_stack (3,1,D) f32
    -> (3,N,D) bf16 where out[p] = x[p] @ w[p] + b[p]."""
    P, N, Din = x_stack.shape
    Dout = w_stack.shape[2]
    grid = (P, N // tm, Dout // tn, Din // tk)
    bytes_accessed = (x_stack.size * x_stack.dtype.itemsize
                      + w_stack.size * w_stack.dtype.itemsize
                      + b_stack.size * b_stack.dtype.itemsize
                      + P * N * Dout * 2)
    return pl.pallas_call(
        _linear_kernel,
        out_shape=jax.ShapeDtypeStruct((P, N, Dout), jnp.bfloat16),
        grid_spec=pltpu.PrefetchScalarGridSpec(
            num_scalar_prefetch=0,
            grid=grid,
            in_specs=[
                pl.BlockSpec((1, tm, tk), lambda p, i, j, kk: (p, i, kk)),
                pl.BlockSpec((1, tk, tn), lambda p, i, j, kk: (p, kk, j)),
                pl.BlockSpec((1, 1, tn), lambda p, i, j, kk: (p, 0, j)),
            ],
            out_specs=pl.BlockSpec((1, tm, tn), lambda p, i, j, kk: (p, i, j)),
            scratch_shapes=[pltpu.VMEM((tm, tn), jnp.float32)],
        ),
        compiler_params=pltpu.CompilerParams(
            dimension_semantics=("parallel", "parallel", "parallel", "arbitrary")),
        cost_estimate=pl.CostEstimate(
            flops=2 * P * N * Din * Dout,
            transcendentals=0,
            bytes_accessed=bytes_accessed),
    )(x_stack, w_stack, b_stack)


# ----------------------------- flash attention -----------------------------

def _flash_attn_kernel(q_ref, k_ref, v_ref, o_ref, m_ref, l_ref, acc_ref, qh_ref,
                       *, n_heads, d_k):
    # q (1,1,tq,D) bf16, k/v (1,1,tkv,D) bf16, o (1,tq,D); D = n_heads*d_k.
    # scratch (online softmax state): m,l (H,tq,1) f32, acc (H,tq,d_k) f32,
    # qh (H,tq,d_k) bf16 holds the per-head q slabs for the whole KV sweep.
    ki = pl.program_id(2)

    @pl.when(ki == 0)
    def _():
        m_ref[...] = jnp.full_like(m_ref, -jnp.inf)
        l_ref[...] = jnp.zeros_like(l_ref)
        acc_ref[...] = jnp.zeros_like(acc_ref)
        q = q_ref[0, 0]                         # (tq, D), scale already folded in
        for h in range(n_heads):                # slice once; reused for every KV block
            qh_ref[h] = q[:, h * d_k:(h + 1) * d_k]

    k = k_ref[0, 0]      # (tkv, D)
    v = v_ref[0, 0]      # (tkv, D)

    # TODO(synk): optional attention mask (masked_fill(-inf) + nan->0) not wired in.
    for h in range(n_heads):                     # static unroll over heads
        sl = slice(h * d_k, (h + 1) * d_k)
        kh, vh = k[:, sl], v[:, sl]
        qh = qh_ref[h]                           # (tq, d_k) bf16, lane-aligned scratch

        # "NT" form: contract the last dims directly -- no explicit transpose of kh.
        s = lax.dot_general(qh, kh, (((1,), (1,)), ((), ())),
                            preferred_element_type=jnp.float32)        # (tq, tkv) f32

        m_prev = m_ref[h]                                              # (tq, 1)
        m_new = jnp.maximum(m_prev, jnp.max(s, axis=-1, keepdims=True))
        alpha = jnp.exp(m_prev - m_new)
        p = jnp.exp(s - m_new)                                         # f32 softmax math
        l_ref[h] = alpha * l_ref[h] + jnp.sum(p, axis=-1, keepdims=True)

        pv = lax.dot_general(p.astype(jnp.bfloat16), vh,
                             (((1,), (0,)), ((), ())),
                             preferred_element_type=jnp.float32)       # (tq, d_k)
        acc_ref[h] = alpha * acc_ref[h] + pv
        m_ref[h] = m_new

    @pl.when(ki == pl.num_programs(2) - 1)
    def _():
        # divide -> reciprocal * multiply; exact (approx=False) to track the reference
        # bit-for-bit in f32 -- it runs once per q tile so cost is negligible.
        outs = [acc_ref[h] * pl.reciprocal(l_ref[h], approx=False)
                for h in range(n_heads)]
        # merged heads -> one lane-dense (tq, D) store
        o_ref[0] = jnp.concatenate(outs, axis=-1).astype(o_ref.dtype)


def pallas_flash_attention(proj, *, n_heads, d_k, tq, tkv, out_dtype):
    """proj: (3, B, S, D) bf16 holding [q_proj, k_proj, v_proj] -> (B, S, D)."""
    _, B, S, D = proj.shape
    grid = (B, S // tq, S // tkv)
    kernel = functools.partial(_flash_attn_kernel, n_heads=n_heads, d_k=d_k)
    return pl.pallas_call(
        kernel,
        out_shape=jax.ShapeDtypeStruct((B, S, D), out_dtype),
        grid_spec=pltpu.PrefetchScalarGridSpec(
            num_scalar_prefetch=0,
            grid=grid,
            in_specs=[
                pl.BlockSpec((1, 1, tq, D), lambda b, qi, ki: (0, b, qi, 0)),
                pl.BlockSpec((1, 1, tkv, D), lambda b, qi, ki: (1, b, ki, 0)),
                pl.BlockSpec((1, 1, tkv, D), lambda b, qi, ki: (2, b, ki, 0)),
            ],
            out_specs=pl.BlockSpec((1, tq, D), lambda b, qi, ki: (b, qi, 0)),
            scratch_shapes=[
                pltpu.VMEM((n_heads, tq, 1), jnp.float32),      # running max m
                pltpu.VMEM((n_heads, tq, 1), jnp.float32),      # running denom l
                pltpu.VMEM((n_heads, tq, d_k), jnp.float32),    # running numerator
                pltpu.VMEM((n_heads, tq, d_k), jnp.bfloat16),   # per-head q slabs
            ],
        ),
        compiler_params=pltpu.CompilerParams(
            dimension_semantics=("parallel", "parallel", "arbitrary")),
        cost_estimate=pl.CostEstimate(
            flops=4 * B * S * S * D,
            transcendentals=B * n_heads * S * S,
            bytes_accessed=3 * B * S * D * 2 + B * S * D * 4),
    )(proj, proj, proj)


# ----------------------------- module wrapper -----------------------------

class MultiHeadAttentionPallas:
    """JAX/Pallas re-implementation of the PyTorch MultiHeadAttention module."""

    def __init__(self, d_model, n_heads, kq_same=False, bias=True, key=None):
        assert d_model % n_heads == 0
        self.d_model = d_model
        self.h = n_heads
        self.d_k = d_model // n_heads
        self.kq_same = kq_same

        if key is None:
            key = jax.random.PRNGKey(0)
        keys = jax.random.split(key, 6)
        bound = 1.0 / (d_model ** 0.5)

        def init_linear(kw, kb):
            # stored input-major: y = x @ W + b
            W = jax.random.uniform(kw, (d_model, d_model), jnp.float32,
                                   minval=-bound, maxval=bound)
            b = (jax.random.uniform(kb, (d_model,), jnp.float32,
                                    minval=-bound, maxval=bound)
                 if bias else jnp.zeros((d_model,), jnp.float32))
            return W, b

        if not kq_same:
            self.Wq, self.bq = init_linear(keys[0], keys[1])
        self.Wk, self.bk = init_linear(keys[2], keys[3])
        self.Wv, self.bv = init_linear(keys[4], keys[5])

    def __call__(self, q, k, v, mask=None):
        if mask is not None:
            raise NotImplementedError("TODO(synk): attention mask not wired in")
        B, S, D = q.shape
        assert D == self.h * self.d_k
        N = B * S
        scale = 1.0 / (self.d_k ** 0.5)

        Wq = self.Wq if not self.kq_same else self.Wk
        bq = self.bq if not self.kq_same else self.bk

        # One fused projection call: stack inputs/weights on a leading axis of 3,
        # fold the 1/sqrt(d_k) scale into the q weights/bias, cast MXU operands to
        # bf16 (all fused by XLA into a single pass over the data).
        x_stack = jnp.stack([q.reshape(N, D), k.reshape(N, D),
                             v.reshape(N, D)]).astype(jnp.bfloat16)
        w_stack = jnp.stack([Wq * scale, self.Wk, self.Wv]).astype(jnp.bfloat16)
        b_stack = jnp.stack([bq * scale, self.bk, self.bv]).reshape(3, 1, D)

        tm = _pick_tile(N, (512, 256, 128, 64, 32, 16, 8))
        tn = _pick_tile(D, (512, 256, 128))
        tk = _pick_tile(D, (512, 256, 128))
        proj = pallas_fused_qkv_projection(x_stack, w_stack, b_stack,
                                           tm=tm, tn=tn, tk=tk)   # (3, N, D) bf16
        proj = proj.reshape(3, B, S, D)                           # metadata-only reshape

        tq = _pick_tile(S, (256, 128, 64, 32, 16, 8))
        tkv = _pick_tile(S, (512, 256, 128, 64, 32, 16, 8))
        return pallas_flash_attention(proj, n_heads=self.h, d_k=self.d_k,
                                      tq=tq, tkv=tkv, out_dtype=q.dtype)


# ----------------------------- references (pure JAX) -----------------------------

def reference_forward_f32(mha, q, k, v):
    """Pure-f32 transcription of the PyTorch module (the semantic spec)."""
    B, S, D = q.shape
    Wq = mha.Wq if not mha.kq_same else mha.Wk
    bq = mha.bq if not mha.kq_same else mha.bk
    def lin(x, W, b): return x @ W + b
    qp, kp, vp = lin(q, Wq, bq), lin(k, mha.Wk, mha.bk), lin(v, mha.Wv, mha.bv)
    def split(x): return x.reshape(B, S, mha.h, mha.d_k).transpose(0, 2, 1, 3)
    qh, kh, vh = split(qp), split(kp), split(vp)
    s = jnp.einsum("bhqd,bhkd->bhqk", qh, kh) / (mha.d_k ** 0.5)
    p = jax.nn.softmax(s - s.max(), axis=-1)
    out = jnp.einsum("bhqk,bhkd->bhqd", p, vh)
    return out.transpose(0, 2, 1, 3).reshape(B, S, D)


def reference_forward_bf16(mha, q, k, v):
    """Mirrors the kernel's precision recipe (bf16 MXU inputs, f32 accumulation,
    f32 softmax, scale folded into the q projection) for a tight comparison."""
    B, S, D = q.shape
    bf = jnp.bfloat16
    scale = 1.0 / (mha.d_k ** 0.5)
    Wq = (mha.Wq if not mha.kq_same else mha.Wk) * scale
    bq = (mha.bq if not mha.kq_same else mha.bk) * scale
    def lin(x, W, b):
        y = jnp.dot(x.reshape(B * S, D).astype(bf), W.astype(bf),
                    preferred_element_type=jnp.float32) + b
        return y.astype(bf).reshape(B, S, D)
    qp, kp, vp = lin(q, Wq, bq), lin(k, mha.Wk, mha.bk), lin(v, mha.Wv, mha.bv)
    def split(x): return x.reshape(B, S, mha.h, mha.d_k).transpose(0, 2, 1, 3)
    qh, kh, vh = split(qp), split(kp), split(vp)
    s = jnp.einsum("bhqd,bhkd->bhqk", qh, kh, preferred_element_type=jnp.float32)
    m = jnp.max(s, axis=-1, keepdims=True)
    e = jnp.exp(s - m)
    l = jnp.sum(e, axis=-1, keepdims=True)
    pv = jnp.einsum("bhqk,bhkd->bhqd", e.astype(bf), vh,
                    preferred_element_type=jnp.float32)
    out = pv / l
    return out.transpose(0, 2, 1, 3).reshape(B, S, D)


# ----------------------------- main -----------------------------

if __name__ == "__main__":
    B, S, d_model, n_heads = 2, 8, 32, 4

    key = jax.random.PRNGKey(0)
    kq_, kk_, kv_, kp_ = jax.random.split(key, 4)
    q = jax.random.normal(kq_, (B, S, d_model), jnp.float32)
    k = jax.random.normal(kk_, (B, S, d_model), jnp.float32)
    v = jax.random.normal(kv_, (B, S, d_model), jnp.float32)

    mha = MultiHeadAttentionPallas(d_model, n_heads, kq_same=False, bias=True, key=kp_)

    out = jax.block_until_ready(mha(q, k, v))
    assert out.shape == (B, S, d_model)

    ref_bf16 = reference_forward_bf16(mha, q, k, v)   # same precision recipe -> tight
    ref_f32 = reference_forward_f32(mha, q, k, v)     # PyTorch f32 math -> bf16-level tol
    assert jnp.allclose(out, ref_bf16, atol=2e-3, rtol=2e-3), "mismatch vs bf16 reference"
    assert jnp.allclose(out, ref_f32, atol=5e-2, rtol=5e-2), "mismatch vs f32 reference"

    print("KERNEL_OK")
</pallas_src>

<mosaic_0001>
module attributes {stable_mosaic.version = 11 : i64} {
  func.func @_linear_kernel(%arg0: i32, %arg1: i32, %arg2: i32, %arg3: i32, %arg4: memref<1x16x32xbf16, #tpu.memory_space<vmem>>, %arg5: memref<1x32x32xbf16, #tpu.memory_space<vmem>>, %arg6: memref<1x1x32xf32, #tpu.memory_space<vmem>>, %arg7: memref<1x16x32xbf16, #tpu.memory_space<vmem>>, %arg8: memref<16x32xf32, #tpu.memory_space<vmem>>) attributes {dimension_semantics = [#tpu.dimension_semantics<parallel>, #tpu.dimension_semantics<parallel>, #tpu.dimension_semantics<parallel>, #tpu.dimension_semantics<arbitrary>], iteration_bounds = array<i64: 3, 1, 1, 1>, scalar_prefetch = 0 : i64, scratch_operands = 1 : i64, tpu.core_type = #tpu.core_type<tc>, window_params = [{transform_indices = @transform_0, window_bounds = array<i64: 1, 16, 32>}, {transform_indices = @transform_1, window_bounds = array<i64: 1, 32, 32>}, {transform_indices = @transform_2, window_bounds = array<i64: 1, 1, 32>}, {transform_indices = @transform_3, window_bounds = array<i64: 1, 16, 32>}]} {
    %c0_i32 = arith.constant 0 : i32
    %0 = arith.cmpi eq, %arg3, %c0_i32 : i32
    %1 = arith.extui %0 : i1 to i32
    %c0_i32_0 = arith.constant 0 : i32
    %2 = arith.cmpi ne, %1, %c0_i32_0 : i32
    scf.if %2 {
      %cst_12 = arith.constant 0.000000e+00 : f32
      %14 = vector.broadcast %cst_12 : f32 to vector<16x32xf32>
      %c0_13 = arith.constant 0 : index
      %c0_14 = arith.constant 0 : index
      %15 = vector.load %arg8[%c0_13, %c0_14] : memref<16x32xf32, #tpu.memory_space<vmem>>, vector<16x32xf32>
      tpu.vector_store %arg8[%c0_13, %c0_14], %14 {strides = array<i32>} : memref<16x32xf32, #tpu.memory_space<vmem>>, vector<16x32xf32>,
    } else {
    }
    %c0 = arith.constant 0 : index
    %c0_1 = arith.constant 0 : index
    %3 = vector.load %arg8[%c0, %c0_1] : memref<16x32xf32, #tpu.memory_space<vmem>>, vector<16x32xf32>
    %c0_2 = arith.constant 0 : index
    %c0_3 = arith.constant 0 : index
    %c0_4 = arith.constant 0 : index
    %4 = vector.load %arg4[%c0_2, %c0_3, %c0_4] : memref<1x16x32xbf16, #tpu.memory_space<vmem>>, vector<1x16x32xbf16>
    %5 = vector.shape_cast %4 : vector<1x16x32xbf16> to vector<16x32xbf16>
    %c0_5 = arith.constant 0 : index
    %c0_6 = arith.constant 0 : index
    %c0_7 = arith.constant 0 : index
    %6 = vector.load %arg5[%c0_5, %c0_6, %c0_7] : memref<1x32x32xbf16, #tpu.memory_space<vmem>>, vector<1x32x32xbf16>
    %7 = vector.shape_cast %6 : vector<1x32x32xbf16> to vector<32x32xbf16>
    %cst = arith.constant dense<0.000000e+00> : vector<16x32xf32>
    %8 = tpu.matmul %5, %7, %cst {dimension_numbers = #tpu.dot_dimension_numbers<[1], [0], [0], [1], [0, 0, 1, 1], [], []>} : vector<16x32xbf16>, vector<32x32xbf16>, vector<16x32xf32> -> vector<16x32xf32>
    %9 = arith.addf %3, %8 : vector<16x32xf32>
    %c0_8 = arith.constant 0 : index
    %c0_9 = arith.constant 0 : index
    %10 = vector.load %arg8[%c0_8, %c0_9] : memref<16x32xf32, #tpu.memory_space<vmem>>, vector<16x32xf32>
    tpu.vector_store %arg8[%c0_8, %c0_9], %9 {strides = array<i32>} : memref<16x32xf32, #tpu.memory_space<vmem>>, vector<16x32xf32>,
    %c0_i32_10 = arith.constant 0 : i32
    %11 = arith.cmpi eq, %arg3, %c0_i32_10 : i32
    %12 = arith.extui %11 : i1 to i32
    %c0_i32_11 = arith.constant 0 : i32
    %13 = arith.cmpi ne, %12, %c0_i32_11 : i32
    scf.if %13 {
      %c0_12 = arith.constant 0 : index
      %c0_13 = arith.constant 0 : index
      %14 = vector.load %arg8[%c0_12, %c0_13] : memref<16x32xf32, #tpu.memory_space<vmem>>, vector<16x32xf32>
      %c0_14 = arith.constant 0 : index
      %c0_15 = arith.constant 0 : index
      %c0_16 = arith.constant 0 : index
      %15 = vector.load %arg6[%c0_14, %c0_15, %c0_16] : memref<1x1x32xf32, #tpu.memory_space<vmem>>, vector<1x1x32xf32>
      %16 = vector.shape_cast %15 : vector<1x1x32xf32> to vector<1x32xf32>
      %17 = vector.broadcast %16 : vector<1x32xf32> to vector<16x32xf32>
      %18 = arith.addf %14, %17 : vector<16x32xf32>
      %19 = arith.truncf %18 : vector<16x32xf32> to vector<16x32xbf16>
      %c0_17 = arith.constant 0 : index
      %c0_18 = arith.constant 0 : index
      %c0_19 = arith.constant 0 : index
      %20 = vector.load %arg7[%c0_17, %c0_18, %c0_19] : memref<1x16x32xbf16, #tpu.memory_space<vmem>>, vector<1x16x32xbf16>
      %21 = vector.shape_cast %20 : vector<1x16x32xbf16> to vector<16x32xbf16>
      %22 = vector.shape_cast %19 : vector<16x32xbf16> to vector<1x16x32xbf16>
      tpu.vector_store %arg7[%c0_17, %c0_18, %c0_19], %22 {strides = array<i32>} : memref<1x16x32xbf16, #tpu.memory_space<vmem>>, vector<1x16x32xbf16>,
    } else {
    }
    return
  }
  func.func @transform_0(%arg0: i32, %arg1: i32, %arg2: i32, %arg3: i32) -> (i32, i32, i32) {
    %c0_i32 = arith.constant 0 : i32
    return %arg0, %arg1, %arg3 : i32, i32, i32
  }
  func.func @transform_1(%arg0: i32, %arg1: i32, %arg2: i32, %arg3: i32) -> (i32, i32, i32) {
    %c0_i32 = arith.constant 0 : i32
    return %arg0, %arg3, %arg2 : i32, i32, i32
  }
  func.func @transform_2(%arg0: i32, %arg1: i32, %arg2: i32, %arg3: i32) -> (i32, i32, i32) {
    %c0_i32 = arith.constant 0 : i32
    %c0_i32_0 = arith.constant 0 : i32
    return %arg0, %c0_i32, %arg2 : i32, i32, i32
  }
  func.func @transform_3(%arg0: i32, %arg1: i32, %arg2: i32, %arg3: i32) -> (i32, i32, i32) {
    %c0_i32 = arith.constant 0 : i32
    return %arg0, %arg1, %arg2 : i32, i32, i32
  }
}

</mosaic_0001>

<bundles_post_ra>
// kernel: tpu_custom_call.1
= control target key start
LH: loop header
LB: loop body
LE: loop exit
PB: predicated region body
PF: predicated region fallthrough
CT: control target
= control target key end

     0   :  { %s1036_s0 = inlined_call_operand.hbm [shape: bf16[3,16,32], index: 0, kind: input, shape index: {}]   ;;  %s1037_s1 = inlined_call_operand.hbm [shape: bf16[3,32,32], index: 1, kind: input, shape index: {}]   ;;  %s1038_s2 = inlined_call_operand.vmem [shape: f32[3,1,32], index: 2, kind: input, shape index: {}]   ;;  %s1039_s3 = inlined_call_operand.hbm [shape: bf16[3,16,32], index: 3, kind: output, shape index: {}]  }
   0x1   :  { %1040 = sst [smem:[#allocation12_spill]] %s1036_s0 }
   0x2   :  { %8 = vsyncpa [#allocation4], 0 }
   0x3   :  { %10 = vsyncpa [#allocation4 + $0x1], 0 }
   0x4   :  { %11 = vsyncpa [#allocation7], 0 }
   0x5   :  { %13 = vsyncpa [#allocation7 + $0x1], 0 }
   0x6   :  { %14 = vsyncpa [#allocation5], 0 }
   0x7   :  { %16 = vsyncpa [#allocation5 + $0x1], 0  ;;  %s848_s12 = smov 0   ;;  %s850_s13 = smov 0  }
   0x8   :  { %s852_s14 = smov 0   ;;  %s854_s15 = smov 0  }
   0x9   :  { %s856_s16 = smov 0   ;;  %s858_s17 = smov 0  }
   0xa LB: > { %s559_s18 = sadd.s32 4294967295, %s817_s17   ;;  %s560_s19 = sadd.s32 4294967294, %s817_s17   ;;  %s817_s17 = sphi %s858_s17, %s22_s17   ;;  %s813_s16 = sphi %s856_s16, %s1052_s16   ;;  %s809_s15 = sphi %s854_s15, %s1051_s15   ;;  %s805_s14 = sphi %s852_s14, %s1050_s14   ;;  %s801_s13 = sphi %s850_s13, %s1049_s13   ;;  %s797_s12 = sphi %s848_s12, %s1048_s12  }
   0xb   : > { %s48_s20 = sadd.s32 1, %s813_s16  ;;  %s59_s21 = sadd.s32 1, %s805_s14 }
   0xc   : > { %p50_p0 = scmp.ge.s32.totalorder %s48_s20, 3  ;;  %p66_p1 = scmp.ne.s32.totalorder %s805_s14, %s801_s13 }
   0xd   : > { %p67_p2 = scmp.eq.s32.totalorder %s817_s17, 0  ;;  %p72_p3 = scmp.ne.s32.totalorder %s801_s13, %s797_s12 }
   0xe   : > { %s1054_s20 = smov (%p50_p0, %s48_s20), 0  ;;  %p73_p5 = scmp.eq.s32.totalorder %s559_s18, 0 }
   0xf   : > { %p889_p4 = por %p67_p2, %p66_p1  ;;  %s52_s23 = ssub.s32 %s813_s16, %s1054_s20 }
  0x10   : > { %p158_p6 = scmp.eq.s32.totalorder %s559_s18, 2  ;;  %p57_p7 = scmp.eq.s32.totalorder %s52_s23, 0 }
  0x11   : > { %p895_p8 = por %p73_p5, %p72_p3  ;;  %p164_p10 = scmp.eq.s32.totalorder %s560_s19, 2 }
  0x12   : > { %p899_p9 = por %p158_p6, %p66_p1  ;;  %p618_p12 = scmp.lt.s32.totalorder %s817_s17, 3 }
  0x13   : > { %s904_s26 = scalar_select %p57_p7, %s805_s14, %s59_s21  }
  0x14   : > { %p906_p11 = por %p164_p10, %p72_p3  ;;  %s912_s28 = sand.u32 1, %s805_s14  }
  0x15   : > { %s563_s29 = sshll.u32 %s912_s28, 3  ;;  %s585_s30 = sshll.u32 %s813_s16, 7 }
  0x16   : > { %s1045_s0 = sld [smem:[#allocation12_spill]]  ;;  %s188_s7 = scalar_lea.vmem [#allocation3], %s563_s29 }
  0x17   : > { %s198_s8 = sshll.u32 %s188_s7, 4  ;;  %p921_p13 = pnand %p618_p12, %p889_p4  ;;  %s199_s8 = int_to_ptr.vmem [resolvable:$true] %s198_s8 }
  0x18   : > { %p569_p0 = scmp.ge.s32.totalorder %s817_s17, 1  ;;  %s185_s10 = scalar_lea.sflag [#allocation4], %s912_s28 }
  0x19   : > { %p679_p1 = pneg %p921_p13  ;;  %s690_s11 = scalar_lea.vmem %s199_s8, 128 }
  0x1a   : > { %p691_p2 = scmp.ne.s32.totalorder %s199_s8, %s690_s11  ;;  %s819_s18 = smov [#allocation3]  }
  0x1b   : > { %s695_s19 = sshll.u32 %s819_s18, 4  ;;  %s696_s19 = int_to_ptr.vmem [resolvable:$false] %s695_s19 }
  0x1c   : > { %s197_s6 = scalar_lea.hbm %s1045_s0, %s585_s30  ;;  %p693_p3 = pnand %p691_p2, %p679_p1 }
  0x1d   : > { %s697_s21 = scalar_lea.vmem %s696_s19, 256  ;;  %p698_p4 = scmp.lt.s32.totalorder %s199_s8, %s696_s19 }
  0x1e   : > { %p694_p5 = pneg %p693_p3  ;;  %p699_p6 = scmp.lt.s32.totalorder %s697_s21, %s690_s11 }
  0x20   : > { %p700_p7 = por %p699_p6, %p698_p4 }
  0x22   : > { %p701_p10 = pnand %p700_p7, %p694_p5 }
  0x24   : > { %704 = shalt.err (!%p701_p10)
}
  0x25   : > { %s820_s22 = smov 64   ;;  %s821_s23 = smov 4  }
  0x26   : > { %610 = dma.hbm_to_vmem [thread:$0]  (!%p921_p13), %s197_s6, 128, %s199_s8, %s185_s10, %s820_s22, %s820_s22, %s821_s23  }
  0x27   : > { %p239_p12 = scmp.lt.s32.totalorder %s817_s17, 4  ;;  %s566_s29 = sshll.u32 %s912_s28, 4 }
  0x28   : > { %s586_s30 = sshll.u32 %s813_s16, 8  ;;  %s212_s18 = scalar_lea.vmem [#allocation6], %s566_s29 }
  0x29   : > { %p939_p2 = pnand %p569_p0, %p239_p12  ;;  %s221_s11 = scalar_lea.hbm %s1037_s1, %s586_s30 }
  0x2a   : > { %s222_s19 = sshll.u32 %s212_s18, 4  ;;  %s209_s21 = scalar_lea.sflag [#allocation7], %s912_s28  ;;  %s223_s19 = int_to_ptr.vmem [resolvable:$true] %s222_s19 }
  0x2b   : > { %s718_s0 = scalar_lea.vmem %s223_s19, 256  ;;  %s822_s6 = smov [#allocation6]  }
  0x2c   : > { %p719_p3 = scmp.ne.s32.totalorder %s223_s19, %s718_s0  ;;  %s723_s8 = sshll.u32 %s822_s6, 4  ;;  %s724_s8 = int_to_ptr.vmem [resolvable:$false] %s723_s8 }
  0x2d   : > { %s725_s10 = scalar_lea.vmem %s724_s8, 512  ;;  %p726_p0 = scmp.lt.s32.totalorder %s223_s19, %s724_s8 }
  0x2e   : > { %p721_p5 = pnand %p719_p3, %p679_p1  ;;  %p727_p6 = scmp.lt.s32.totalorder %s725_s10, %s718_s0 }
  0x30   : > { %p722_p4 = pneg %p721_p5  ;;  %p728_p7 = por %p727_p6, %p726_p0 }
  0x32   : > { %p729_p10 = pnand %p728_p7, %p722_p4 }
  0x34   : > { %732 = shalt.err (!%p729_p10)
}
  0x35   : > { %613 = dma.hbm_to_vmem [thread:$0]  (!%p921_p13), %s221_s11, 256, %s223_s19, %s209_s21, %s820_s22, %s820_s22, %s821_s23  }
  0x36   : > { %243 = sbr.rel (%p939_p2) target bundleno = 297 (0x129), region = 32  ;;  %s955_s28 = sand.u32 (!%p939_p2), 1, %s801_s13  }
  0x37   : > { %s570_s29 = sshll.u32 (!%p939_p2), %s955_s28, 3  ;;  %s246_s30 = scalar_lea.sflag (!%p939_p2), [#allocation4], %s955_s28 }
  0x38   : > { %s249_s0 = scalar_lea.vmem (!%p939_p2), [#allocation3], %s570_s29 }
  0x3b   : > { %784 = dma.done.wait (%p895_p8), %s246_s30, 128  }
  0x3c   : > { %786 = vsyncadd (%p895_p8), %s246_s30, 4294967168  ;;  %s571_s9 = sshll.u32 %s955_s28, 4  ;;  %s255_s22 = scalar_lea.sflag [#allocation7], %s955_s28 }
  0x3d   : > { %s258_s23 = scalar_lea.vmem [#allocation6], %s571_s9 }
  0x3e   : > { %788 = dma.done.wait (%p895_p8), %s255_s22, 256  }
  0x3f   : > { %790 = vsyncadd (%p895_p8), %s255_s22, 4294967040  ;;  %vm306_vm0 = vcmask 261120   ;;  %v823_v0 = vmov 0.0   ;;  %vm824_vm1 = vmmov 0   ;;  %v674_v1 = vld [vmem:[%s258_s23 + $0x8] sm:$0xff]   ;;  %v675_v2 = vld [vmem:[%s258_s23] sm:$0xff]  }
  0x40   : > { %593 = vmatprep.subr.bf16.mxu0 %v823_v0  ;;  %597 = vmatprep.mubr.msk.bf16.mxu0 %vm824_vm1, %v823_v0  ;;  %307 = vst.msk [vmem:[#allocation2] sm:$0xff] %vm306_vm0, %v823_v0  ;;  %308 = vst.msk [vmem:[#allocation2 + $0x8] sm:$0xff] %vm306_vm0, %v823_v0  ;;  %v676_v3 = vld [vmem:[%s249_s0] sm:$0xff]   ;;  %p294_p8 = scmp.lt.s32.totalorder %s809_s15, 2  ;;  %vm405_vm2 = vcmask 257024   ;;  %s589_s11 = sshll.u32 %s809_s15, 7 }
  0x41   : > { %594 = vmatpush3.bf16.msra.mxu0 %v674_v1  ;;  %s291_s18 = scalar_lea.vmem [#allocation8], %s570_s29  ;;  %s987_s8 = scalar_lea.hbm %s1039_s3, %s589_s11 }
  0x42   : > { %595 = vmatprep.subr.bf16.mxu0 %v823_v0  ;;  %s295_s24 = scalar_select %p294_p8, %s809_s15, 2 }
  0x43   : > { %s425_s19 = sshll.u32 %s291_s18, 4  ;;  %s409_s10 = scalar_lea.sflag [#allocation5], %s955_s28  ;;  %s989_s19 = int_to_ptr.vmem [resolvable:$true] %s425_s19 }
  0x44   : > { %s299_s7 = scalar_lea.vmem %s1038_s2, %s295_s24  ;;  %s733_s15 = scalar_lea.vmem %s989_s19, 128 }
  0x45   : > { %596 = vmatpush3.bf16.msra.mxu0 %v675_v2  ;;  %v577_v12 = vld [vmem:[%s299_s7] ss:$0 sm:$0xff]  ;;  %p734_p13 = scmp.ne.s32.totalorder %s989_s19, %s733_s15  ;;  %s825_s29 = smov [#allocation8]  }
  0x46   : > { %s737_s30 = sshll.u32 %s825_s29, 4  ;;  %s738_s30 = int_to_ptr.vmem [resolvable:$false] %s737_s30 }
  0x47   : > { %v309_v4 = vld [vmem:[#allocation2] sm:$0xff]  ;;  %v310_v8 = vld [vmem:[#allocation2 + $0x8] sm:$0xff]  ;;  %p735_p1 = pnand %p734_p13, %p899_p9  ;;  %s739_s0 = scalar_lea.vmem %s738_s30, 256 }
  0x48   : > { %598 = vmatmul.mubr.msk.bf16.vlgmr.msra.gmra.mxu0 %vm306_vm0, %v676_v3  ;;  %p740_p2 = scmp.lt.s32.totalorder %s989_s19, %s738_s30  ;;  %p741_p3 = scmp.lt.s32.totalorder %s739_s0, %s733_s15 }
  0x49   : > { %p736_p12 = pneg %p735_p1 }
  0x4a   : > { %p742_p5 = por %p741_p3, %p740_p2 }
  0x4c   : > { %p743_p4 = pnand %p742_p5, %p736_p12 }
 0x108   : > { %v372_v5 = vpop.f32.mrf.mxu0 }
 0x109   : > { %v379_v6 = vadd.f32 %v372_v5, %v309_v4 }
 0x10a   : > { %v599_v7 = vpop.f32.mrf.mxu0 }
 0x10b   : > { %381 = vst.msk [vmem:[#allocation2] sm:$0xff] %vm306_vm0, %v379_v6 }
 0x10c   : > { %v375_v9 = vpop.f32.mrf.mxu0 }
 0x10d   : > { %v380_v10 = vadd.f32 %v375_v9, %v310_v8 }
 0x10e   : > { %v600_v11 = vpop.f32.mrf.mxu0 }
 0x10f   : > { %382 = vst.msk [vmem:[#allocation2 + $0x8] sm:$0xff] %vm306_vm0, %v380_v10 }
 0x112   : > { %v386_v13 = vld [vmem:[#allocation2] sm:$0xff] }
 0x113   : > { %v395_v14 = vadd.f32 %v577_v12, %v386_v13 }
 0x115   : > { %v587_v15 = vpack.c.bf16 %v395_v14, %v395_v14 }
 0x116   : > { %v387_v16 = vld [vmem:[#allocation2 + $0x8] sm:$0xff] }
 0x117   : > { %v396_v17 = vadd.f32 %v577_v12, %v387_v16  ;;  %406 = vst.msk [vmem:[%s291_s18] sm:$0xf] %vm405_vm2, %v587_v15 }
 0x119   : > { %v588_v18 = vpack.c.bf16 %v396_v17, %v396_v17 }
 0x11b   : > { %407 = vst.msk [vmem:[%s291_s18 + $0x4] sm:$0xf] %vm405_vm2, %v588_v18 }
 0x11c   : > { %746 = shalt.err (!%p743_p4)
}
 0x11d   : > { %s747_s9 = scalar_lea.hbm %s987_s8, 128  ;;  %s751_s24 = scalar_lea.hbm %s1039_s3, 384 }
 0x11e   : > { %p748_p0 = scmp.ne.s32.totalorder %s987_s8, %s747_s9  ;;  %p752_p10 = scmp.lt.s32.totalorder %s987_s8, %s1039_s3 }
 0x11f   : > { %p753_p8 = scmp.lt.s32.totalorder %s751_s24, %s747_s9 }
 0x120   : > { %p749_p6 = pnand %p748_p0, %p899_p9 }
 0x121   : > { %p754_p13 = por %p753_p8, %p752_p10 }
 0x122   : > { %p750_p7 = pneg %p749_p6 }
 0x124   : > { %p755_p1 = pnand %p754_p13, %p750_p7 }
 0x126   : > { %758 = shalt.err (!%p755_p1)
}
 0x127   : > { %s826_s7 = smov 64   ;;  %s827_s11 = smov 4  }
 0x128   : > { %605 = dma.vmem_to_hbm [thread:$0]  (%p899_p9), %s989_s19, 128, %s987_s8, %s409_s10, %s826_s7, %s826_s7, %s827_s11  }
 0x129 PF: > { %p619_p12 = scmp.ge.s32.totalorder %s817_s17, 2  ;;  %s440_s18 = sand.u32 1, %s797_s12  }
 0x12a   : > { %s441_s21 = scalar_lea.sflag [#allocation5], %s440_s18 }
 0x12b   : > { %p615_p2 = pnand %p619_p12, %p906_p11 }
 0x12d   : > { %p616_p3 = pneg %p615_p2 }
 0x12f   : > { %792 = dma.done.wait (%p616_p3), %s441_s21, 128  }
 0x130   : > { %794 = vsyncadd (%p616_p3), %s441_s21, 4294967168  ;;  %s22_s17 = sadd.s32 1, %s817_s17   ;;  %s1048_s12 = smov %s801_s13 }
 0x131   : > { %p19_p5 = scmp.ge.s32.totalorder %s22_s17, 5   ;;  %s1049_s13 = smov %s805_s14 }
 0x132   : > { %s1050_s14 = smov %s904_s26  ;;  %s1051_s15 = smov %s813_s16 }
 0x133   : > { %s1052_s16 = smov %s1054_s20  ;;  %21 = sbr.rel (!%p19_p5) target bundleno = 10 (0xa), region = 101 }
 0x138   :  { %446 = vsyncpa [#allocation4], 1 }
 0x139   :  { %448 = vsyncpa [#allocation4 + $0x1], 1 }
 0x13a   :  { %449 = vsyncpa [#allocation7], 1 }
 0x13b   :  { %451 = vsyncpa [#allocation7 + $0x1], 1 }
 0x13c   :  { %452 = vsyncpa [#allocation5], 1 }
 0x13d   :  { %454 = vsyncpa [#allocation5 + $0x1], 1 }

</bundles_post_ra>
